<compile_context>
chip_gen: v6e
topology: v6e:2x2x1
jax: 0.10.0
libtpu: 0.0.40
codegen_flags: <defaults>
</compile_context>

<pallas_src>
import jax
import jax.numpy as jnp
from jax.experimental import pallas as pl
from jax.experimental.pallas import tpu as pltpu

SUB = 8  # sublane multiple: batch tile must be a multiple of this


def _round_up(n, m):
    return (n + m - 1) // m * m


def qnet_kernel(x_ref, w1_ref, b1_ref, w2_ref, b2_ref, o_ref):
    # fc1 + ReLU: MXU matmul with f32 accumulation, VPU bias add / max.
    h = jnp.dot(x_ref[...], w1_ref[...], preferred_element_type=jnp.float32)
    h = jnp.maximum(h + b1_ref[...], 0.0)
    # fc2: narrow (batch-tile x action_dim) output store.
    q = jnp.dot(h, w2_ref[...], preferred_element_type=jnp.float32)
    o_ref[...] = (q + b2_ref[...]).astype(o_ref.dtype)


def qnet_forward(x, w1, b1, w2, b2, *, block_batch=4096):
    """relu(x @ w1 + b1) @ w2 + b2 with a batch-tiled Pallas kernel.

    x:  [batch, state_dim]
    w1: [state_dim, hidden_dim], b1: [hidden_dim] (or [1, hidden_dim])
    w2: [hidden_dim, action_dim], b2: [action_dim] (or [1, action_dim])
    """
    batch, state_dim = x.shape
    hidden_dim = w1.shape[1]
    action_dim = w2.shape[1]

    f32 = jnp.float32
    x = x.astype(f32)
    w1 = w1.astype(f32)
    w2 = w2.astype(f32)
    b1 = jnp.reshape(b1, (1, hidden_dim)).astype(f32)
    b2 = jnp.reshape(b2, (1, action_dim)).astype(f32)

    # Batch tile: as large as reasonable (amortize per-step grid overhead),
    # multiple of 8, but capped so medium/large batches give >= 2 grid steps
    # (so the "parallel" axis can land on both v7x TensorCores).
    batch_r = _round_up(batch, SUB)
    tb = min(block_batch, batch_r)
    if batch_r > 2 * SUB:
        tb = min(tb, _round_up(pl.cdiv(batch_r, 2), SUB))
    tb = _round_up(tb, SUB)
    grid = pl.cdiv(batch, tb)

    flops = 2 * batch * (state_dim * hidden_dim + hidden_dim * action_dim)
    bytes_accessed = 4 * (batch * state_dim                      # x
                          + state_dim * hidden_dim + hidden_dim  # w1, b1
                          + hidden_dim * action_dim + action_dim  # w2, b2
                          + batch * action_dim)                  # q out

    out = pl.pallas_call(
        qnet_kernel,
        out_shape=jax.ShapeDtypeStruct((batch, action_dim), f32),
        grid_spec=pltpu.PrefetchScalarGridSpec(
            num_scalar_prefetch=0,
            grid=(grid,),
            in_specs=[
                # Batch-tiled activations (pipelined HBM->VMEM per grid step);
                # last dim equals the full array dim -> tiling rule satisfied.
                pl.BlockSpec((tb, state_dim), lambda i: (i, 0)),
                # Parameters: full-array blocks, same index every step ->
                # single DMA, resident in VMEM across the whole grid.
                pl.BlockSpec((state_dim, hidden_dim), lambda i: (0, 0)),
                pl.BlockSpec((1, hidden_dim), lambda i: (0, 0)),
                pl.BlockSpec((hidden_dim, action_dim), lambda i: (0, 0)),
                pl.BlockSpec((1, action_dim), lambda i: (0, 0)),
            ],
            out_specs=pl.BlockSpec((tb, action_dim), lambda i: (i, 0)),
        ),
        compiler_params=pltpu.CompilerParams(
            # Batch tiles are independent -> shard across v7x's 2 TensorCores
            # (no-op on single-core v5e/v6e).
            dimension_semantics=("parallel",),
        ),
        cost_estimate=pl.CostEstimate(
            flops=flops, transcendentals=0, bytes_accessed=bytes_accessed),
    )(x, w1, b1, w2, b2)
    return out


def init_params(key, state_dim, hidden_dim, action_dim):
    # Mirrors torch.nn.Linear's U(-1/sqrt(fan_in), 1/sqrt(fan_in)) init.
    k1, k2, k3, k4 = jax.random.split(key, 4)
    bound1 = 1.0 / jnp.sqrt(state_dim)
    bound2 = 1.0 / jnp.sqrt(hidden_dim)
    w1 = jax.random.uniform(k1, (state_dim, hidden_dim), jnp.float32, -bound1, bound1)
    b1 = jax.random.uniform(k2, (hidden_dim,), jnp.float32, -bound1, bound1)
    w2 = jax.random.uniform(k3, (hidden_dim, action_dim), jnp.float32, -bound2, bound2)
    b2 = jax.random.uniform(k4, (action_dim,), jnp.float32, -bound2, bound2)
    return w1, b1, w2, b2


def _reference(x, w1, b1, w2, b2):
    return jnp.maximum(x @ w1 + b1[None, :], 0.0) @ w2 + b2[None, :]


if __name__ == "__main__":
    state_dim, hidden_dim, action_dim = 4, 32, 2   # CartPole-style dims
    key = jax.random.PRNGKey(0)
    kx, kx2, kp = jax.random.split(key, 3)
    w1, b1, w2, b2 = init_params(kp, state_dim, hidden_dim, action_dim)

    # Small batch (single grid step).
    x = jax.random.normal(kx, (8, state_dim), jnp.float32)
    out = qnet_forward(x, w1, b1, w2, b2)
    jax.block_until_ready(out)
    assert out.shape == (8, action_dim)
    assert jnp.allclose(out, _reference(x, w1, b1, w2, b2), atol=1e-5, rtol=1e-5)

    # Larger, non-tile-multiple batch to exercise the batch grid + partial
    # last tile + the >=2-tile split for v7x megacore.
    x2 = jax.random.normal(kx2, (300, state_dim), jnp.float32)
    out2 = qnet_forward(x2, w1, b1, w2, b2, block_batch=128)
    jax.block_until_ready(out2)
    assert out2.shape == (300, action_dim)
    assert jnp.allclose(out2, _reference(x2, w1, b1, w2, b2), atol=1e-5, rtol=1e-5)

    # Default (large) tile path as well.
    out3 = qnet_forward(x2, w1, b1, w2, b2)
    jax.block_until_ready(out3)
    assert jnp.allclose(out3, _reference(x2, w1, b1, w2, b2), atol=1e-5, rtol=1e-5)

    print("KERNEL_OK")
</pallas_src>

<mosaic_0001>
module attributes {stable_mosaic.version = 11 : i64} {
  func.func @qnet_kernel(%arg0: i32, %arg1: memref<8x4xf32, #tpu.memory_space<vmem>>, %arg2: memref<4x32xf32, #tpu.memory_space<vmem>>, %arg3: memref<1x32xf32, #tpu.memory_space<vmem>>, %arg4: memref<32x2xf32, #tpu.memory_space<vmem>>, %arg5: memref<1x2xf32, #tpu.memory_space<vmem>>, %arg6: memref<8x2xf32, #tpu.memory_space<vmem>>) attributes {dimension_semantics = [#tpu.dimension_semantics<parallel>], iteration_bounds = array<i64: 1>, scalar_prefetch = 0 : i64, scratch_operands = 0 : i64, tpu.core_type = #tpu.core_type<tc>, window_params = [{transform_indices = @transform_0, window_bounds = array<i64: 8, 4>}, {pipeline_mode = #tpu.pipeline_mode<synchronous>, transform_indices = @transform_1, window_bounds = array<i64: 4, 32>}, {pipeline_mode = #tpu.pipeline_mode<synchronous>, transform_indices = @transform_2, window_bounds = array<i64: 1, 32>}, {pipeline_mode = #tpu.pipeline_mode<synchronous>, transform_indices = @transform_3, window_bounds = array<i64: 32, 2>}, {pipeline_mode = #tpu.pipeline_mode<synchronous>, transform_indices = @transform_4, window_bounds = array<i64: 1, 2>}, {transform_indices = @transform_5, window_bounds = array<i64: 8, 2>}]} {
    %c0 = arith.constant 0 : index
    %c0_0 = arith.constant 0 : index
    %0 = vector.load %arg1[%c0, %c0_0] : memref<8x4xf32, #tpu.memory_space<vmem>>, vector<8x4xf32>
    %c0_1 = arith.constant 0 : index
    %c0_2 = arith.constant 0 : index
    %1 = vector.load %arg2[%c0_1, %c0_2] : memref<4x32xf32, #tpu.memory_space<vmem>>, vector<4x32xf32>
    %cst = arith.constant dense<0.000000e+00> : vector<8x32xf32>
    %2 = tpu.matmul %0, %1, %cst {dimension_numbers = #tpu.dot_dimension_numbers<[1], [0], [0], [1], [0, 0, 1, 1], [], []>} : vector<8x4xf32>, vector<4x32xf32>, vector<8x32xf32> -> vector<8x32xf32>
    %c0_3 = arith.constant 0 : index
    %c0_4 = arith.constant 0 : index
    %3 = vector.load %arg3[%c0_3, %c0_4] : memref<1x32xf32, #tpu.memory_space<vmem>>, vector<1x32xf32>
    %4 = vector.broadcast %3 : vector<1x32xf32> to vector<8x32xf32>
    %5 = arith.addf %2, %4 : vector<8x32xf32>
    %cst_5 = arith.constant 0.000000e+00 : f32
    %6 = vector.broadcast %cst_5 : f32 to vector<8x32xf32>
    %7 = arith.maximumf %5, %6 : vector<8x32xf32>
    %c0_6 = arith.constant 0 : index
    %c0_7 = arith.constant 0 : index
    %8 = vector.load %arg4[%c0_6, %c0_7] : memref<32x2xf32, #tpu.memory_space<vmem>>, vector<32x2xf32>
    %cst_8 = arith.constant dense<0.000000e+00> : vector<8x2xf32>
    %9 = tpu.matmul %7, %8, %cst_8 {dimension_numbers = #tpu.dot_dimension_numbers<[1], [0], [0], [1], [0, 0, 1, 1], [], []>} : vector<8x32xf32>, vector<32x2xf32>, vector<8x2xf32> -> vector<8x2xf32>
    %c0_9 = arith.constant 0 : index
    %c0_10 = arith.constant 0 : index
    %10 = vector.load %arg5[%c0_9, %c0_10] : memref<1x2xf32, #tpu.memory_space<vmem>>, vector<1x2xf32>
    %11 = vector.broadcast %10 : vector<1x2xf32> to vector<8x2xf32>
    %12 = arith.addf %9, %11 : vector<8x2xf32>
    %c0_11 = arith.constant 0 : index
    %c0_12 = arith.constant 0 : index
    %13 = vector.load %arg6[%c0_11, %c0_12] : memref<8x2xf32, #tpu.memory_space<vmem>>, vector<8x2xf32>
    tpu.vector_store %arg6[%c0_11, %c0_12], %12 {strides = array<i32>} : memref<8x2xf32, #tpu.memory_space<vmem>>, vector<8x2xf32>,
    return
  }
  func.func @transform_0(%arg0: i32) -> (i32, i32) {
    %c0_i32 = arith.constant 0 : i32
    %c0_i32_0 = arith.constant 0 : i32
    return %arg0, %c0_i32 : i32, i32
  }
  func.func @transform_1(%arg0: i32) -> (i32, i32) {
    %c0_i32 = arith.constant 0 : i32
    %c0_i32_0 = arith.constant 0 : i32
    %c0_i32_1 = arith.constant 0 : i32
    return %c0_i32, %c0_i32_0 : i32, i32
  }
  func.func @transform_2(%arg0: i32) -> (i32, i32) {
    %c0_i32 = arith.constant 0 : i32
    %c0_i32_0 = arith.constant 0 : i32
    %c0_i32_1 = arith.constant 0 : i32
    return %c0_i32, %c0_i32_0 : i32, i32
  }
  func.func @transform_3(%arg0: i32) -> (i32, i32) {
    %c0_i32 = arith.constant 0 : i32
    %c0_i32_0 = arith.constant 0 : i32
    %c0_i32_1 = arith.constant 0 : i32
    return %c0_i32, %c0_i32_0 : i32, i32
  }
  func.func @transform_4(%arg0: i32) -> (i32, i32) {
    %c0_i32 = arith.constant 0 : i32
    %c0_i32_0 = arith.constant 0 : i32
    %c0_i32_1 = arith.constant 0 : i32
    return %c0_i32, %c0_i32_0 : i32, i32
  }
  func.func @transform_5(%arg0: i32) -> (i32, i32) {
    %c0_i32 = arith.constant 0 : i32
    %c0_i32_0 = arith.constant 0 : i32
    return %arg0, %c0_i32 : i32, i32
  }
}

</mosaic_0001>

<bundles_post_ra>
// kernel: tpu_custom_call.1
= control target key start
LH: loop header
LB: loop body
LE: loop exit
PB: predicated region body
PF: predicated region fallthrough
CT: control target
= control target key end

     0   :  { %vm33_vm0 = vcmask 1043456   ;;  %vm29_vm1 = vcmask 31744   ;;  %v229_v0 = vmov 0.0   ;;  %vm230_vm2 = vmmov 0   ;;  %s288_s1 = inlined_call_operand.vmem [shape: f32[4,32], index: 1, kind: input, shape index: {}]   ;;  %s289_s0 = inlined_call_operand.vmem [shape: f32[8,4], index: 0, kind: input, shape index: {}]   ;;  %s290_s3 = inlined_call_operand.vmem [shape: f32[32,2], index: 3, kind: input, shape index: {}]   ;;  %s291_s2 = inlined_call_operand.vmem [shape: f32[1,32], index: 2, kind: input, shape index: {}]   ;;  %s292_s4 = inlined_call_operand.vmem [shape: f32[1,2], index: 4, kind: input, shape index: {}]   ;;  %s293_s5 = inlined_call_operand.vmem [shape: f32[8,2], index: 5, kind: output, shape index: {}]  }
   0x1   :  { %211 = vmatprep.subr.mxu0 %v229_v0  ;;  %v21_v1 = vld [vmem:[%s288_s1] sm:$0xf]  ;;  %213 = vmatprep.mubr.msk.f32.mxu0 %vm230_vm2, %v229_v0  ;;  %v111_v3 = vld [vmem:[%s290_s3 + $0x18] sm:$0xff]  ;;  %v110_v4 = vld [vmem:[%s290_s3 + $0x10] sm:$0xff]  ;;  %vm119_vm3 = vcmask 261120   ;;  %vm193_vm4 = vcmask 15360  }
   0x2   :  { %v20_v2 = vld [vmem:[%s289_s0] sm:$0xff]  ;;  %212 = vmatpush3.msk.msra.mxu0 %vm33_vm0, %v21_v1  ;;  %216 = vmatprep.subr.mxu1 %v229_v0  ;;  %v109_v5 = vld [vmem:[%s290_s3 + $0x8] sm:$0xff] }
   0x3   :  { %214 = vmatmul.mubr.msk.f32.vlgmr.msra.gmra.mxu0 %vm29_vm1, %v20_v2  ;;  %217 = vmatpush3.msra.mxu1 %v111_v3  ;;  %v108_v6 = vld [vmem:[%s290_s3] sm:$0xff] }
   0x4   :  { %218 = vmatprep.subr.mxu1 %v229_v0  ;;  %224 = vmatprep.mubr.msk.f32.mxu1 %vm230_vm2, %v229_v0  ;;  %v199_v7 = vld [vmem:[%s291_s2] ss:$0 sm:$0xff] }
   0x5   :  { %219 = vmatpush3.msra.mxu1 %v110_v4  ;;  %v202_v12 = vld [vmem:[%s292_s4] ss:$0 sm:$0xff] }
   0x6   :  { %220 = vmatprep.subr.mxu1 %v229_v0 }
   0x7   :  { %221 = vmatpush3.msra.mxu1 %v109_v5 }
   0x8   :  { %222 = vmatprep.subr.mxu1 %v229_v0 }
   0x9   :  { %223 = vmatpush3.msra.mxu1 %v108_v6 }
  0xc3   :  { %v103_v8 = vpop.f32.mrf.mxu0 }
  0xc4   :  { %v104_v9 = vadd.f32 %v199_v7, %v103_v8 }
  0xc5   :  { %v215_v10 = vpop.f32.mrf.mxu0 }
  0xc6   :  { %v107_v11 = vmax.f32 %v104_v9, 0.0 }
  0xc8   :  { %225 = vmatmul.mubr.msk.f32.vlgmr.msra.gmra.mxu1 %vm119_vm3, %v107_v11 }
 0x188   :  { %v189_v13 = vpop.f32.mrf.mxu1 }
 0x189   :  { %v190_v14 = vadd.f32 %v202_v12, %v189_v13 }
 0x18a   :  { %v226_v15 = vpop.f32.mrf.mxu1 }
 0x18b   :  { %194 = vst.msk [vmem:[%s293_s5] sm:$0xff] %vm193_vm4, %v190_v14 }

</bundles_post_ra>
